<compile_context>
chip_gen: v7x
topology: tpu7x:2x2x1
jax: 0.10.0
libtpu: 0.0.40
codegen_flags: <defaults>
</compile_context>

<pallas_src>
import math

import jax
import jax.numpy as jnp
from jax.experimental import pallas as pl
from jax.experimental.pallas import tpu as pltpu

# ---- physical constants (same as the PyTorch module) ----------------------
A_e = (0.9144 / 2) ** 2 * math.pi
FRAME_TIME = 0.1
G = 9.81
V_e = 2570.0
m_0 = 28122.7269
p_e = 70.9275
p_inf = 40.34

STATE_DIM = 4  # [x, y, vx, vy]


def _euler_step(y, vy, m_dot_p):
    """One scalar rocket dynamics step (identical math to the PyTorch module)."""
    denom = m_0 - m_dot_p * FRAME_TIME
    a_r = (m_dot_p * V_e + (p_e - p_inf) * A_e - denom * G) / denom
    vy_new = vy + a_r * FRAME_TIME
    y_new = y + vy * FRAME_TIME + 0.5 * a_r * FRAME_TIME ** 2
    return y_new, vy_new


# ---------------------------------------------------------------------------
# Single-step kernel: exact equivalent of Dynamics.forward(state, action).
# Everything (loads, math, stores) on the scalar path via SMEM refs.
# ---------------------------------------------------------------------------
def _dynamics_kernel(state_ref, action_ref, out_ref):
    y_new, vy_new = _euler_step(state_ref[0, 1], state_ref[0, 3], action_ref[0, 0])
    out_ref[0, 0] = state_ref[0, 0]
    out_ref[0, 1] = y_new
    out_ref[0, 2] = state_ref[0, 2]
    out_ref[0, 3] = vy_new


def dynamics_forward(state, action):
    """Pallas equivalent of Dynamics.forward(state, action). state:(1,4) action:(1,1)."""
    state = state.astype(jnp.float32)
    action = action.astype(jnp.float32)
    return pl.pallas_call(
        _dynamics_kernel,
        out_shape=jax.ShapeDtypeStruct(state.shape, jnp.float32),
        in_specs=[
            pl.BlockSpec(memory_space=pltpu.SMEM),
            pl.BlockSpec(memory_space=pltpu.SMEM),
        ],
        out_specs=pl.BlockSpec(memory_space=pltpu.SMEM),
    )(state, action)


# ---------------------------------------------------------------------------
# Fused T-step rollout kernel: applies Dynamics.forward T times inside one
# pallas_call, keeping (y, vy) in scalar registers across the loop.
# ---------------------------------------------------------------------------
def _rollout_kernel(state_ref, actions_ref, out_ref):
    num_steps = actions_ref.shape[0]

    def body(t, carry):
        y, vy = carry
        return _euler_step(y, vy, actions_ref[t, 0])

    y_f, vy_f = jax.lax.fori_loop(
        0, num_steps, body, (state_ref[0, 1], state_ref[0, 3])
    )
    out_ref[0, 0] = state_ref[0, 0]
    out_ref[0, 1] = y_f
    out_ref[0, 2] = state_ref[0, 2]
    out_ref[0, 3] = vy_f


def dynamics_rollout(state, actions):
    """Apply Dynamics.forward once per row of `actions` (shape (T, 1)) in one kernel."""
    state = state.astype(jnp.float32)
    actions = actions.astype(jnp.float32)
    return pl.pallas_call(
        _rollout_kernel,
        out_shape=jax.ShapeDtypeStruct(state.shape, jnp.float32),
        in_specs=[
            pl.BlockSpec(memory_space=pltpu.SMEM),
            pl.BlockSpec(memory_space=pltpu.SMEM),
        ],
        out_specs=pl.BlockSpec(memory_space=pltpu.SMEM),
    )(state, actions)


# ---------------------------------------------------------------------------
# Pure-jnp reference mirroring the PyTorch module exactly.
# ---------------------------------------------------------------------------
def _reference_forward(state, action):
    y = state[0, 1]
    vy = state[0, 3]
    m_dot_p = action[0, 0]
    denom = m_0 - m_dot_p * FRAME_TIME
    a_r = (m_dot_p * V_e + (p_e - p_inf) * A_e - denom * G) / denom
    vy_new = vy + a_r * FRAME_TIME
    y_new = y + vy * FRAME_TIME + 0.5 * a_r * FRAME_TIME ** 2
    new_state = state.at[0, 1].set(y_new)
    new_state = new_state.at[0, 3].set(vy_new)
    return new_state


if __name__ == "__main__":
    key = jax.random.PRNGKey(0)
    k_state, k_action, k_roll = jax.random.split(key, 3)

    # state = [x, y, vx, vy]; action = [m_dot_p]
    state = jax.random.normal(k_state, (1, STATE_DIM), dtype=jnp.float32) * 10.0
    action = jnp.abs(jax.random.normal(k_action, (1, 1), dtype=jnp.float32)) * 100.0

    # --- single step (matches Dynamics.forward) ---
    out = jax.block_until_ready(dynamics_forward(state, action))
    ref = _reference_forward(state, action)
    assert out.shape == state.shape and out.dtype == jnp.float32
    assert jnp.allclose(out, ref, rtol=1e-5, atol=1e-4), (out, ref)

    # --- fused T-step rollout (amortizes launch/DMA overhead) ---
    T = 8
    actions = jnp.abs(jax.random.normal(k_roll, (T, 1), dtype=jnp.float32)) * 100.0
    out_roll = jax.block_until_ready(dynamics_rollout(state, actions))
    ref_roll = state
    for t in range(T):
        ref_roll = _reference_forward(ref_roll, actions[t : t + 1, :])
    assert jnp.allclose(out_roll, ref_roll, rtol=1e-5, atol=1e-3), (out_roll, ref_roll)

    print("KERNEL_OK")
</pallas_src>

<mosaic_0001>
module attributes {stable_mosaic.version = 11 : i64} {
  func.func @_dynamics_kernel(%arg0: memref<1x4xf32, #tpu.memory_space<smem>>, %arg1: memref<1x1xf32, #tpu.memory_space<smem>>, %arg2: memref<1x4xf32, #tpu.memory_space<smem>>) attributes {dimension_semantics = [], scalar_prefetch = 0 : i64, scratch_operands = 0 : i64, tpu.core_type = #tpu.core_type<tc>} {
    %c0 = arith.constant 0 : index
    %c1 = arith.constant 1 : index
    %0 = memref.load %arg0[%c0, %c1] : memref<1x4xf32, #tpu.memory_space<smem>>
    %c0_0 = arith.constant 0 : index
    %c3 = arith.constant 3 : index
    %1 = memref.load %arg0[%c0_0, %c3] : memref<1x4xf32, #tpu.memory_space<smem>>
    %c0_1 = arith.constant 0 : index
    %c0_2 = arith.constant 0 : index
    %2 = memref.load %arg1[%c0_1, %c0_2] : memref<1x1xf32, #tpu.memory_space<smem>>
    %cst = arith.constant 1.000000e-01 : f32
    %3 = arith.mulf %2, %cst : f32
    %cst_3 = arith.constant 28122.7266 : f32
    %4 = arith.subf %cst_3, %3 : f32
    %cst_4 = arith.constant 2.570000e+03 : f32
    %5 = arith.mulf %2, %cst_4 : f32
    %cst_5 = arith.constant 20.0865936 : f32
    %6 = arith.addf %5, %cst_5 : f32
    %cst_6 = arith.constant 9.810000e+00 : f32
    %7 = arith.mulf %4, %cst_6 : f32
    %8 = arith.subf %6, %7 : f32
    %9 = arith.divf %8, %4 : f32
    %cst_7 = arith.constant 1.000000e-01 : f32
    %10 = arith.mulf %9, %cst_7 : f32
    %11 = arith.addf %1, %10 : f32
    %cst_8 = arith.constant 1.000000e-01 : f32
    %12 = arith.mulf %1, %cst_8 : f32
    %13 = arith.addf %0, %12 : f32
    %cst_9 = arith.constant 5.000000e-01 : f32
    %14 = arith.mulf %cst_9, %9 : f32
    %cst_10 = arith.constant 0.00999999977 : f32
    %15 = arith.mulf %14, %cst_10 : f32
    %16 = arith.addf %13, %15 : f32
    %c0_11 = arith.constant 0 : index
    %c0_12 = arith.constant 0 : index
    %17 = memref.load %arg0[%c0_11, %c0_12] : memref<1x4xf32, #tpu.memory_space<smem>>
    %c0_13 = arith.constant 0 : index
    %c0_14 = arith.constant 0 : index
    %18 = memref.load %arg2[%c0_13, %c0_14] : memref<1x4xf32, #tpu.memory_space<smem>>
    memref.store %17, %arg2[%c0_13, %c0_14] : memref<1x4xf32, #tpu.memory_space<smem>>
    %c0_15 = arith.constant 0 : index
    %c1_16 = arith.constant 1 : index
    %19 = memref.load %arg2[%c0_15, %c1_16] : memref<1x4xf32, #tpu.memory_space<smem>>
    memref.store %16, %arg2[%c0_15, %c1_16] : memref<1x4xf32, #tpu.memory_space<smem>>
    %c0_17 = arith.constant 0 : index
    %c2 = arith.constant 2 : index
    %20 = memref.load %arg0[%c0_17, %c2] : memref<1x4xf32, #tpu.memory_space<smem>>
    %c0_18 = arith.constant 0 : index
    %c2_19 = arith.constant 2 : index
    %21 = memref.load %arg2[%c0_18, %c2_19] : memref<1x4xf32, #tpu.memory_space<smem>>
    memref.store %20, %arg2[%c0_18, %c2_19] : memref<1x4xf32, #tpu.memory_space<smem>>
    %c0_20 = arith.constant 0 : index
    %c3_21 = arith.constant 3 : index
    %22 = memref.load %arg2[%c0_20, %c3_21] : memref<1x4xf32, #tpu.memory_space<smem>>
    memref.store %11, %arg2[%c0_20, %c3_21] : memref<1x4xf32, #tpu.memory_space<smem>>
    return
  }
}

</mosaic_0001>

<bundles_post_ra>
// kernel: tpu_custom_call.1
= control target key start
LH: loop header
LB: loop body
LE: loop exit
PB: predicated region body
PF: predicated region fallthrough
CT: control target
= control target key end

     0   :  { %8 = vsyncpa [#allocation5], 0  ;;  %s143_s0 = inlined_call_operand.vmem [shape: f32[1,4], index: 0, kind: input, shape index: {}]   ;;  %s144_s1 = inlined_call_operand.<no memory space> [shape: f32[1,1], index: 1, kind: input, shape index: {}]   ;;  %s145_s2 = inlined_call_operand.hbm [shape: f32[1,4], index: 2, kind: output, shape index: {}]  }
   0x1   :  { %9 = vsyncpa [#allocation4], 0  ;;  %s16_s11 = sshll.u32 %s143_s0, 4  ;;  %s17_s11 = int_to_ptr.vmem [resolvable:$true] %s16_s11 }
   0x2   :  { %s79_s12 = scalar_lea.vmem %s17_s11, 16  ;;  %p84_p1 = scmp.lt.s32.totalorder %s17_s11, %s17_s11 }
   0x3   :  { %p80_p0 = scmp.ne.s32.totalorder %s17_s11, %s79_s12  ;;  %p85_p2 = scmp.lt.s32.totalorder %s79_s12, %s79_s12 }
   0x5   :  { %p86_p3 = por %p85_p2, %p84_p1 }
   0x7   :  { %p87_p4 = pnand %p86_p3, %p80_p0 }
   0x9   :  { %90 = shalt.err (!%p87_p4)
}
   0xa   :  { %s105_s13 = smov [#allocation3]  }
   0xb   :  { %19 = dma.vmem_to_smem %s17_s11, 16, %s105_s13, [#allocation5]  }
   0xc   :  { %101 = dma.done.wait [#allocation5], 16  }
   0xd   :  { %102 = vsyncadd [#allocation5], 4294967280 }
   0xe   :  { %25 = sfence }
   0xf   :  { %s29_s16 = smul.f32 0.1, %s144_s1  ;;  %s46_s18 = sld [smem:[#allocation3]] }
  0x10   :  { %s72_s0 = sld [smem:[#allocation3 + $0x2]]  ;;  %s31_s21 = smul.f32 2570.0, %s144_s1 }
  0x11   :  { %s30_s17 = ssub.f32 28122.727, %s29_s16  ;;  %s71_s22 = sld [smem:[#allocation3 + $0x3]] }
  0x12   :  { %s32_s23 = sadd.f32 20.086594, %s31_s21  ;;  %s70_s25 = sld [smem:[#allocation3 + $0x1]] }
  0x13   :  { %v35_v0 = vstv %s30_s17  ;;  %s33_s24 = smul.f32 9.81, %s30_s17  ;;  %s91_s1 = scalar_lea.hbm %s145_s2, 16 }
  0x14   :  { %77 = vrcp.f32 %v35_v0  ;;  %p92_p5 = scmp.ne.s32.totalorder %s145_s2, %s91_s1  ;;  %p95_p6 = scmp.lt.u32.totalorder %s91_s1, %s145_s2 }
  0x15   :  { %48 = sst [smem:[#allocation6]] %s46_s18 }
  0x16   :  { %53 = sst [smem:[#allocation6 + $0x2]] %s72_s0  ;;  %p97_p7 = pnand %p95_p6, %p92_p5 }
  0x17   :  { %s34_s26 = ssub.f32 %s32_s23, %s33_s24  ;;  %s41_s28 = smul.f32 0.1, %s71_s22 }
  0x19   :  { %s42_s3 = sadd.f32 %s70_s25, %s41_s28 }
  0x1e   :  { %v78_v1 = vpop.eup %77 }
  0x1f   :  { %73 = vpush %v78_v1 }
  0x50   :  { %s74_s27 = spop %73 }
  0x51   :  { %s38_s29 = smul.f32 %s74_s27, %s34_s26 }
  0x53   :  { %s39_s30 = smul.f32 0.1, %s38_s29 }
  0x54   :  { %s43_s4 = smul.f32 0.5, %s38_s29 }
  0x55   :  { %s40_s5 = sadd.f32 %s71_s22, %s39_s30 }
  0x56   :  { %s44_s6 = smul.f32 0.01, %s43_s4 }
  0x57   :  { %55 = sst [smem:[#allocation6 + $0x3]] %s40_s5 }
  0x58   :  { %s45_s7 = sadd.f32 %s44_s6, %s42_s3 }
  0x5a   :  { %50 = sst [smem:[#allocation6 + $0x1]] %s45_s7 }
  0x5b   :  { %100 = shalt.err (!%p97_p7)
}
  0x5c   :  { %s106_s14 = smov [#allocation6]  }
  0x5d   :  { %63 = dma.smem_to_hbm %s106_s14, 16, %s145_s2, [#allocation4]  }
  0x5e   :  { %103 = dma.done.wait [#allocation4], 16  }
  0x5f   :  { %104 = vsyncadd [#allocation4], 4294967280 }
  0x60   :  { %67 = sfence }
  0x61   :  { %68 = vsyncpa [#allocation4], 1 }
  0x62   :  { %69 = vsyncpa [#allocation5], 1 }

</bundles_post_ra>
